<compile_context>
chip_gen: v7x
topology: tpu7x:2x2x1
jax: 0.10.0
libtpu: 0.0.40
codegen_flags: <defaults>
</compile_context>

<pallas_src>
import functools
import math

import jax
import jax.numpy as jnp
from jax.experimental import pallas as pl
from jax.experimental.pallas import tpu as pltpu


# ----------------------------- small helpers -----------------------------

_HAS_BUFFERED = hasattr(pl, "Buffered")


def _spec(shape, index_map, single_buffer=False):
    """BlockSpec; optionally single-buffered (for grid-invariant / cheap inputs)."""
    if single_buffer and _HAS_BUFFERED:
        try:
            return pl.BlockSpec(shape, index_map, pipeline_mode=pl.Buffered(1))
        except (TypeError, ValueError):
            pass
    return pl.BlockSpec(shape, index_map)


@functools.lru_cache(maxsize=1)
def _vmem_limit_bytes():
    # Raise the default 32 MiB scoped-VMEM cap: ~3/4 of physical (<=100 MiB) on
    # v5e/v6e (128 MiB), ~48 MiB on v7x (64 MiB physical).
    try:
        cap = int(pltpu.get_tpu_info().vmem_capacity_bytes)
        return int(min(cap * 3 // 4, 100 * 1024 * 1024))
    except Exception:
        return 48 * 1024 * 1024


def _cparams(dimension_semantics):
    return pltpu.CompilerParams(dimension_semantics=dimension_semantics,
                                vmem_limit_bytes=_vmem_limit_bytes())


def _pick_tile(dim, target, align):
    """Largest multiple of `align` that divides `dim` and is <= target; else full dim."""
    if dim <= target:
        return dim
    t = (target // align) * align
    while t >= align:
        if dim % t == 0:
            return t
        t -= align
    return dim


# ----------------------------- tiled linear (+ bias + activation) -----------------------------

def _linear_kernel(x_ref, w_ref, b_ref, o_ref, acc_ref, *, activation):
    @pl.when(pl.program_id(2) == 0)
    def _():
        acc_ref[...] = jnp.zeros_like(acc_ref)

    # x/w are stored bf16 in HBM; MXU accumulates in f32.
    acc_ref[...] += jnp.dot(x_ref[...], w_ref[...],
                            preferred_element_type=jnp.float32)

    @pl.when(pl.program_id(2) == pl.num_programs(2) - 1)
    def _():
        y = acc_ref[...] + b_ref[...]
        if activation == "gelu":
            # TODO(synk): HF BERT uses exact erf-GELU; tanh approximation used here.
            y = jax.nn.gelu(y)
        elif activation == "tanh":
            y = jnp.tanh(y)
        o_ref[...] = y.astype(o_ref.dtype)


def linear(x, w, b, activation=None, *, tm=512, tn=512, tk=512):
    # x: [M, K] bf16, w: [K, N] bf16, b: [N] f32  ->  [M, N] bf16
    M, K = x.shape
    N = w.shape[1]
    bm = _pick_tile(M, tm, 16)      # bf16 sublane tile is (16, 128)
    bn = _pick_tile(N, tn, 128)
    bk = _pick_tile(K, tk, 128)
    grid = (M // bm, N // bn, K // bk)
    return pl.pallas_call(
        functools.partial(_linear_kernel, activation=activation),
        out_shape=jax.ShapeDtypeStruct((M, N), x.dtype),
        grid=grid,
        in_specs=[pl.BlockSpec((bm, bk), lambda i, j, k: (i, k)),
                  pl.BlockSpec((bk, bn), lambda i, j, k: (k, j)),
                  _spec((1, bn), lambda i, j, k: (0, j), single_buffer=True)],
        out_specs=pl.BlockSpec((bm, bn), lambda i, j, k: (i, j)),
        scratch_shapes=[pltpu.VMEM((bm, bn), jnp.float32)],
        compiler_params=_cparams(("parallel", "parallel", "arbitrary")),
    )(x, w, b.reshape(1, N))


# ------------------ tiled linear fused with residual-add + layernorm ------------------

def _linear_res_ln_kernel(x_ref, w_ref, b_ref, r_ref, g_ref, beta_ref, o_ref, acc_ref):
    @pl.when(pl.program_id(1) == 0)
    def _():
        acc_ref[...] = jnp.zeros_like(acc_ref)

    acc_ref[...] += jnp.dot(x_ref[...], w_ref[...],
                            preferred_element_type=jnp.float32)

    @pl.when(pl.program_id(1) == pl.num_programs(1) - 1)
    def _():
        y = acc_ref[...] + b_ref[...] + r_ref[...].astype(jnp.float32)
        mu = jnp.mean(y, axis=-1, keepdims=True)
        var = jnp.mean(jnp.square(y - mu), axis=-1, keepdims=True)
        y = (y - mu) * jax.lax.rsqrt(var + 1e-12)
        o_ref[...] = (y * g_ref[...] + beta_ref[...]).astype(o_ref.dtype)


def linear_res_ln(x, w, b, residual, g, beta, *, tm=512, tk=512):
    # LayerNorm(residual + x @ w + b) * g + beta, fused.  N block = full H so the
    # layernorm row reduction sees the whole hidden dim.
    M, K = x.shape
    N = w.shape[1]
    bm = _pick_tile(M, tm, 16)
    bk = _pick_tile(K, tk, 128)
    grid = (M // bm, K // bk)
    return pl.pallas_call(
        _linear_res_ln_kernel,
        out_shape=jax.ShapeDtypeStruct((M, N), x.dtype),
        grid=grid,
        in_specs=[pl.BlockSpec((bm, bk), lambda i, k: (i, k)),
                  pl.BlockSpec((bk, N), lambda i, k: (k, 0)),
                  # grid-invariant (across k) inputs: single-buffer to reclaim VMEM
                  _spec((1, N), lambda i, k: (0, 0), single_buffer=True),
                  _spec((bm, N), lambda i, k: (i, 0), single_buffer=True),
                  _spec((1, N), lambda i, k: (0, 0), single_buffer=True),
                  _spec((1, N), lambda i, k: (0, 0), single_buffer=True)],
        out_specs=pl.BlockSpec((bm, N), lambda i, k: (i, 0)),
        scratch_shapes=[pltpu.VMEM((bm, N), jnp.float32)],
        compiler_params=_cparams(("parallel", "arbitrary")),
    )(x, w, b.reshape(1, N), residual, g.reshape(1, N), beta.reshape(1, N))


# ------------------ fully fused FFN: gelu(x@w1+b1)@w2 + b2 + residual -> LN ------------------

def _ffn_res_ln_kernel(x_ref, w1_ref, b1_ref, w2_ref, b2_ref, g_ref, beta_ref, o_ref):
    x = x_ref[...]                                                  # (bm, H) bf16
    h = jnp.dot(x, w1_ref[...], preferred_element_type=jnp.float32) + b1_ref[...]
    # TODO(synk): HF BERT uses exact erf-GELU; tanh approximation used here.
    h = jax.nn.gelu(h)
    y = jnp.dot(h.astype(w2_ref.dtype), w2_ref[...],
                preferred_element_type=jnp.float32)
    y = y + b2_ref[...] + x.astype(jnp.float32)                     # residual is x itself
    mu = jnp.mean(y, axis=-1, keepdims=True)
    var = jnp.mean(jnp.square(y - mu), axis=-1, keepdims=True)
    y = (y - mu) * jax.lax.rsqrt(var + 1e-12)
    o_ref[...] = (y * g_ref[...] + beta_ref[...]).astype(o_ref.dtype)


def ffn_res_ln(x, w1, b1, w2, b2, g, beta, *, tm=512):
    # One kernel for the whole FFN block -> fewer pallas_call launches per layer.
    M, H = x.shape
    I = w1.shape[1]
    bm = _pick_tile(M, tm, 16)
    grid = (M // bm,)
    return pl.pallas_call(
        _ffn_res_ln_kernel,
        out_shape=jax.ShapeDtypeStruct((M, H), x.dtype),
        grid=grid,
        in_specs=[pl.BlockSpec((bm, H), lambda i: (i, 0)),
                  _spec((H, I), lambda i: (0, 0), single_buffer=True),
                  _spec((1, I), lambda i: (0, 0), single_buffer=True),
                  _spec((I, H), lambda i: (0, 0), single_buffer=True),
                  _spec((1, H), lambda i: (0, 0), single_buffer=True),
                  _spec((1, H), lambda i: (0, 0), single_buffer=True),
                  _spec((1, H), lambda i: (0, 0), single_buffer=True)],
        out_specs=pl.BlockSpec((bm, H), lambda i: (i, 0)),
        compiler_params=_cparams(("parallel",)),
    )(x, w1, b1.reshape(1, I), w2, b2.reshape(1, H), g.reshape(1, H), beta.reshape(1, H))


# ----------------------------- attention on the fused QKV tensor -----------------------------

def _mha_heads(q, k, v, add_mask, n_heads, dh, out_dtype):
    # q/k/v: (S, n_heads*dh) bf16 with 1/sqrt(dh) already folded into q;
    # add_mask: (1, S) additive f32.  Returns (S, n_heads*dh).
    outs = []
    for h in range(n_heads):                 # static unroll; n_heads per step is small
        sl = slice(h * dh, (h + 1) * dh)
        s = jax.lax.dot_general(q[:, sl], k[:, sl], (((1,), (1,)), ((), ())),
                                preferred_element_type=jnp.float32)   # (S, S)
        s = s + add_mask
        s = s - jnp.max(s, axis=-1, keepdims=True)
        p = jnp.exp(s)
        p = p * pl.reciprocal(jnp.sum(p, axis=-1, keepdims=True), approx=True)
        outs.append(jnp.dot(p.astype(v.dtype), v[:, sl],
                            preferred_element_type=jnp.float32))
    return jnp.concatenate(outs, axis=-1).astype(out_dtype)


def _attention_fused_kernel(qkv_ref, m_ref, o_ref, *, num_heads, head_dim):
    # all heads of one batch element; qkv block is (1, S, 3H), output is token-major.
    H = num_heads * head_dim
    qkv = qkv_ref[0]                                                  # (S, 3H)
    o_ref[0] = _mha_heads(qkv[:, :H], qkv[:, H:2 * H], qkv[:, 2 * H:],
                          m_ref[0, 0], num_heads, head_dim, o_ref.dtype)


def _attention_grouped_kernel(q_ref, k_ref, v_ref, m_ref, o_ref, *, group_heads, head_dim):
    o_ref[0] = _mha_heads(q_ref[0], k_ref[0], v_ref[0], m_ref[0, 0],
                          group_heads, head_dim, o_ref.dtype)


def attention(qkv, add_mask, *, num_heads, head_dim):
    # qkv: [B, S, 3H] bf16 (fused Q|K|V columns, scale pre-folded into Q);
    # add_mask: [B, 1, 1, S] additive.  Returns ctx [B, S, H] in token-major layout,
    # so no XLA head split / merge transposes are needed around this kernel.
    B, S, _ = qkv.shape
    H = num_heads * head_dim

    # smallest head group whose column width is lane-aligned (e.g. BERT-base dh=64 -> 2)
    gh = 0
    for cand in range(1, num_heads + 1):
        if num_heads % cand == 0 and (cand * head_dim) % 128 == 0:
            gh = cand
            break

    if gh and num_heads // gh > 1:
        # head-group tiled: bounds live (gh, S, S) intermediates and gives B * n_groups
        # parallel grid units for v7x's two TensorCores.
        # TODO(synk): for very long sequences also tile KV blocks with an online softmax.
        gdh = gh * head_dim
        n_groups = num_heads // gh
        return pl.pallas_call(
            functools.partial(_attention_grouped_kernel,
                              group_heads=gh, head_dim=head_dim),
            out_shape=jax.ShapeDtypeStruct((B, S, H), qkv.dtype),
            grid=(B, n_groups),
            in_specs=[pl.BlockSpec((1, S, gdh), lambda b, g: (b, 0, g)),
                      pl.BlockSpec((1, S, gdh), lambda b, g: (b, 0, n_groups + g)),
                      pl.BlockSpec((1, S, gdh), lambda b, g: (b, 0, 2 * n_groups + g)),
                      pl.BlockSpec((1, 1, 1, S), lambda b, g: (b, 0, 0, 0))],
            out_specs=pl.BlockSpec((1, S, gdh), lambda b, g: (b, 0, g)),
            compiler_params=_cparams(("parallel", "parallel")),
        )(qkv, qkv, qkv, add_mask)

    # fallback (small models / toy shapes): all heads of one batch element per step.
    return pl.pallas_call(
        functools.partial(_attention_fused_kernel,
                          num_heads=num_heads, head_dim=head_dim),
        out_shape=jax.ShapeDtypeStruct((B, S, H), qkv.dtype),
        grid=(B,),
        in_specs=[pl.BlockSpec((1, S, 3 * H), lambda b: (b, 0, 0)),
                  pl.BlockSpec((1, 1, 1, S), lambda b: (b, 0, 0, 0))],
        out_specs=pl.BlockSpec((1, S, H), lambda b: (b, 0, 0)),
        compiler_params=_cparams(("parallel",)),
    )(qkv, add_mask)


# ----------------------------- embeddings: add + layernorm fused -----------------------------

def _embed_ln_kernel(w_ref, p_ref, t_ref, g_ref, b_ref, o_ref):
    x = (w_ref[0].astype(jnp.float32) + p_ref[...].astype(jnp.float32)
         + t_ref[...].astype(jnp.float32))
    mu = jnp.mean(x, axis=-1, keepdims=True)
    var = jnp.mean(jnp.square(x - mu), axis=-1, keepdims=True)
    y = (x - mu) * jax.lax.rsqrt(var + 1e-12)
    o_ref[0] = (y * g_ref[...] + b_ref[...]).astype(o_ref.dtype)


def embed_layernorm(word_emb, pos_emb, type_row, g, b):
    # word_emb: [B, S, H] (gathered), pos_emb: [S, H], type_row: [1, H]
    B, S, H = word_emb.shape
    return pl.pallas_call(
        _embed_ln_kernel,
        out_shape=jax.ShapeDtypeStruct((B, S, H), word_emb.dtype),
        grid=(B,),
        in_specs=[pl.BlockSpec((1, S, H), lambda i: (i, 0, 0)),
                  _spec((S, H), lambda i: (0, 0), single_buffer=True),
                  _spec((1, H), lambda i: (0, 0), single_buffer=True),
                  _spec((1, H), lambda i: (0, 0), single_buffer=True),
                  _spec((1, H), lambda i: (0, 0), single_buffer=True)],
        out_specs=pl.BlockSpec((1, S, H), lambda i: (i, 0, 0)),
        compiler_params=_cparams(("parallel",)),
    )(word_emb, pos_emb, type_row, g.reshape(1, H), b.reshape(1, H))


# ----------------------------- fused pooler + classification heads -----------------------------

def _pooler_heads_kernel(x_ref, wp_ref, bp_ref, wh_ref, bh_ref, o_ref):
    pooled = jnp.tanh(jnp.dot(x_ref[...], wp_ref[...],
                              preferred_element_type=jnp.float32) + bp_ref[...])
    # dropout(pooled) == identity at inference
    o_ref[...] = (jnp.dot(pooled.astype(wh_ref.dtype), wh_ref[...],
                          preferred_element_type=jnp.float32)
                  + bh_ref[...]).astype(o_ref.dtype)


def pooler_and_heads(cls_tok, pool_w, pool_b, head_w, head_b):
    # cls_tok: [B, H] bf16; head_w: [H, Np] bf16 (lane-dense, Np multiple of 128).
    B, H = cls_tok.shape
    Np = head_w.shape[1]
    return pl.pallas_call(
        _pooler_heads_kernel,
        out_shape=jax.ShapeDtypeStruct((B, Np), jnp.float32),
        grid=(1,),
        in_specs=[pl.BlockSpec((B, H), lambda i: (0, 0)),
                  pl.BlockSpec((H, H), lambda i: (0, 0)),
                  pl.BlockSpec((1, H), lambda i: (0, 0)),
                  pl.BlockSpec((H, Np), lambda i: (0, 0)),
                  pl.BlockSpec((1, Np), lambda i: (0, 0))],
        out_specs=pl.BlockSpec((B, Np), lambda i: (0, 0)),
        compiler_params=_cparams(("arbitrary",)),
    )(cls_tok, pool_w, pool_b.reshape(1, H), head_w, head_b.reshape(1, Np))


# ----------------------------- parameter init -----------------------------

def init_params(key, cfg):
    keys = iter(jax.random.split(key, 64))
    H, I, L = cfg["hidden"], cfg["intermediate"], cfg["num_issue_labels"]
    dh = H // cfg["heads"]
    scale = 1.0 / math.sqrt(dh)

    def nrm(shape, s=0.02, dtype=jnp.bfloat16):
        return (s * jax.random.normal(next(keys), shape)).astype(dtype)

    def zeros(*shape):
        return jnp.zeros(shape, jnp.float32)

    def ones(*shape):
        return jnp.ones(shape, jnp.float32)

    # matmul weights & embeddings stored bf16 (halves HBM traffic); LN params / biases f32
    params = {
        "word_emb": nrm((cfg["vocab"], H)),
        "pos_emb": nrm((cfg["max_pos"], H)),
        "type_emb": nrm((2, H)),
        "emb_ln_g": ones(H), "emb_ln_b": zeros(H),
        "layers": [],
        "pool_w": nrm((H, H)), "pool_b": zeros(H),
        "issue_w": nrm((H, L)), "issue_b": zeros(L),
        "disp_w": nrm((H, 1)), "disp_b": zeros(1),
    }
    for _ in range(cfg["layers"]):
        # fused Q|K|V projection with the 1/sqrt(dh) scale folded into the Q columns
        wqkv = (0.02 * jax.random.normal(next(keys), (H, 3 * H))).astype(jnp.float32)
        wqkv = wqkv.at[:, :H].multiply(scale)
        bqkv = zeros(3 * H).at[:H].multiply(scale)
        params["layers"].append({
            "wqkv": wqkv.astype(jnp.bfloat16), "bqkv": bqkv,
            "wo": nrm((H, H)), "bo": zeros(H),
            "ln1_g": ones(H), "ln1_b": zeros(H),
            "w1": nrm((H, I)), "b1": zeros(I),
            "w2": nrm((I, H)), "b2": zeros(H),
            "ln2_g": ones(H), "ln2_b": zeros(H),
        })
    return params


# ----------------------------- forward pass -----------------------------

def neo_bert_finetuner_forward(params, input_ids, attention_mask, cfg):
    B, S = input_ids.shape
    H = cfg["hidden"]
    nH = cfg["heads"]
    dh = H // nH
    L = cfg["num_issue_labels"]

    # TODO(synk): embedding-table gather (dynamic row lookup) is left to XLA.
    word = params["word_emb"][input_ids]                               # [B, S, H] bf16
    # word + position + token-type adds fused into the embedding layernorm kernel.
    x = embed_layernorm(word, params["pos_emb"][:S], params["type_emb"][0:1],
                        params["emb_ln_g"], params["emb_ln_b"])        # [B, S, H] bf16
    x = x.reshape(B * S, H)
    # TODO(synk): nn.Dropout(p=0.1) is identity in eval mode; no stochastic drop applied.

    add_mask = ((1.0 - attention_mask.astype(jnp.float32)) * -1e4).reshape(B, 1, 1, S)

    for lp in params["layers"]:
        # fused QKV projection: one [H, 3H] matmul (scale pre-folded into Q columns).
        qkv = linear(x, lp["wqkv"], lp["bqkv"])                        # [B*S, 3H] bf16
        # attention reads the fused QKV tensor and writes token-major ctx;
        # the reshapes below are metadata-only (no HBM layout round trips).
        ctx = attention(qkv.reshape(B, S, 3 * H), add_mask,
                        num_heads=nH, head_dim=dh).reshape(B * S, H)
        # attention output projection fused with residual-add + layernorm.
        x = linear_res_ln(ctx, lp["wo"], lp["bo"], x, lp["ln1_g"], lp["ln1_b"])
        # whole FFN (matmul + gelu + matmul + residual + layernorm) in one kernel.
        x = ffn_res_ln(x, lp["w1"], lp["b1"], lp["w2"], lp["b2"],
                       lp["ln2_g"], lp["ln2_b"])

    cls_tok = x.reshape(B, S, H)[:, 0, :]                              # [B, H]

    # BERT pooler (tanh on [CLS]) + both classification heads fused into one kernel,
    # head weights concatenated and padded to a lane-dense 128-wide output slab.
    head_w = jnp.concatenate([params["issue_w"], params["disp_w"]], axis=1)   # [H, L+1]
    head_b = jnp.concatenate([params["issue_b"], params["disp_b"]], axis=0)   # [L+1]
    pad = (-head_w.shape[1]) % 128
    if pad:
        head_w = jnp.pad(head_w, ((0, 0), (0, pad)))
        head_b = jnp.pad(head_b, ((0, pad),))
    logits = pooler_and_heads(cls_tok, params["pool_w"], params["pool_b"],
                              head_w, head_b)                          # [B, >=128] f32
    issue_logits = logits[:, :L]
    disp_logits = logits[:, L]          # disposition head, .squeeze(-1)
    return issue_logits, disp_logits


# ----------------------------- main -----------------------------

if __name__ == "__main__":
    cfg = dict(vocab=100, max_pos=32, hidden=32, heads=2, intermediate=64,
               layers=2, num_issue_labels=14)

    key = jax.random.PRNGKey(0)
    pkey, ikey = jax.random.split(key)
    params = init_params(pkey, cfg)

    B, S = 2, 8
    input_ids = jax.random.randint(ikey, (B, S), 0, cfg["vocab"], dtype=jnp.int32)
    attention_mask = jnp.array([[1, 1, 1, 1, 1, 1, 1, 1],
                                [1, 1, 1, 1, 1, 0, 0, 0]], dtype=jnp.int32)

    issue_logits, disp_logits = neo_bert_finetuner_forward(
        params, input_ids, attention_mask, cfg)
    jax.block_until_ready((issue_logits, disp_logits))

    assert issue_logits.shape == (B, cfg["num_issue_labels"])
    assert disp_logits.shape == (B,)
    assert issue_logits.dtype == jnp.float32 and disp_logits.dtype == jnp.float32
    print("KERNEL_OK")
</pallas_src>

<mosaic_0001>
module attributes {stable_mosaic.version = 11 : i64} {
  func.func @_embed_ln_kernel(%arg0: i32, %arg1: memref<1x8x32xbf16, #tpu.memory_space<vmem>>, %arg2: memref<8x32xbf16, #tpu.memory_space<vmem>>, %arg3: memref<1x32xbf16, #tpu.memory_space<vmem>>, %arg4: memref<1x32xf32, #tpu.memory_space<vmem>>, %arg5: memref<1x32xf32, #tpu.memory_space<vmem>>, %arg6: memref<1x8x32xbf16, #tpu.memory_space<vmem>>) attributes {dimension_semantics = [#tpu.dimension_semantics<parallel>], iteration_bounds = array<i64: 2>, scalar_prefetch = 0 : i64, scratch_operands = 0 : i64, tpu.core_type = #tpu.core_type<tc>, window_params = [{transform_indices = @transform_0, window_bounds = array<i64: 1, 8, 32>}, {pipeline_mode = #tpu.pipeline_mode<synchronous>, transform_indices = @transform_1, window_bounds = array<i64: 8, 32>}, {pipeline_mode = #tpu.pipeline_mode<synchronous>, transform_indices = @transform_2, window_bounds = array<i64: 1, 32>}, {pipeline_mode = #tpu.pipeline_mode<synchronous>, transform_indices = @transform_3, window_bounds = array<i64: 1, 32>}, {pipeline_mode = #tpu.pipeline_mode<synchronous>, transform_indices = @transform_4, window_bounds = array<i64: 1, 32>}, {transform_indices = @transform_5, window_bounds = array<i64: 1, 8, 32>}]} {
    %c0 = arith.constant 0 : index
    %c0_0 = arith.constant 0 : index
    %c0_1 = arith.constant 0 : index
    %0 = vector.load %arg1[%c0, %c0_0, %c0_1] : memref<1x8x32xbf16, #tpu.memory_space<vmem>>, vector<1x8x32xbf16>
    %1 = vector.shape_cast %0 : vector<1x8x32xbf16> to vector<8x32xbf16>
    %2 = arith.extf %1 : vector<8x32xbf16> to vector<8x32xf32>
    %c0_2 = arith.constant 0 : index
    %c0_3 = arith.constant 0 : index
    %3 = vector.load %arg2[%c0_2, %c0_3] : memref<8x32xbf16, #tpu.memory_space<vmem>>, vector<8x32xbf16>
    %4 = arith.extf %3 : vector<8x32xbf16> to vector<8x32xf32>
    %5 = arith.addf %2, %4 : vector<8x32xf32>
    %c0_4 = arith.constant 0 : index
    %c0_5 = arith.constant 0 : index
    %6 = vector.load %arg3[%c0_4, %c0_5] : memref<1x32xbf16, #tpu.memory_space<vmem>>, vector<1x32xbf16>
    %7 = arith.extf %6 : vector<1x32xbf16> to vector<1x32xf32>
    %8 = vector.broadcast %7 : vector<1x32xf32> to vector<8x32xf32>
    %9 = arith.addf %5, %8 : vector<8x32xf32>
    %cst = arith.constant dense<0.000000e+00> : vector<8xf32>
    %10 = vector.multi_reduction <add>, %9, %cst [1] : vector<8x32xf32> to vector<8xf32>
    %11 = vector.shape_cast %10 : vector<8xf32> to vector<8x1xf32>
    %cst_6 = arith.constant 3.200000e+01 : f32
    %12 = vector.broadcast %cst_6 : f32 to vector<8x1xf32>
    %13 = arith.divf %11, %12 : vector<8x1xf32>
    %14 = vector.broadcast %13 : vector<8x1xf32> to vector<8x32xf32>
    %15 = arith.subf %9, %14 : vector<8x32xf32>
    %16 = arith.mulf %15, %15 : vector<8x32xf32>
    %cst_7 = arith.constant dense<0.000000e+00> : vector<8xf32>
    %17 = vector.multi_reduction <add>, %16, %cst_7 [1] : vector<8x32xf32> to vector<8xf32>
    %18 = vector.shape_cast %17 : vector<8xf32> to vector<8x1xf32>
    %cst_8 = arith.constant 3.200000e+01 : f32
    %19 = vector.broadcast %cst_8 : f32 to vector<8x1xf32>
    %20 = arith.divf %18, %19 : vector<8x1xf32>
    %21 = vector.broadcast %13 : vector<8x1xf32> to vector<8x32xf32>
    %22 = arith.subf %9, %21 : vector<8x32xf32>
    %cst_9 = arith.constant 9.99999996E-13 : f32
    %23 = vector.broadcast %cst_9 : f32 to vector<8x1xf32>
    %24 = arith.addf %20, %23 : vector<8x1xf32>
    %25 = math.rsqrt %24 : vector<8x1xf32>
    %26 = vector.broadcast %25 : vector<8x1xf32> to vector<8x32xf32>
    %27 = arith.mulf %22, %26 : vector<8x32xf32>
    %c0_10 = arith.constant 0 : index
    %c0_11 = arith.constant 0 : index
    %28 = vector.load %arg4[%c0_10, %c0_11] : memref<1x32xf32, #tpu.memory_space<vmem>>, vector<1x32xf32>
    %29 = vector.broadcast %28 : vector<1x32xf32> to vector<8x32xf32>
    %30 = arith.mulf %27, %29 : vector<8x32xf32>
    %c0_12 = arith.constant 0 : index
    %c0_13 = arith.constant 0 : index
    %31 = vector.load %arg5[%c0_12, %c0_13] : memref<1x32xf32, #tpu.memory_space<vmem>>, vector<1x32xf32>
    %32 = vector.broadcast %31 : vector<1x32xf32> to vector<8x32xf32>
    %33 = arith.addf %30, %32 : vector<8x32xf32>
    %34 = arith.truncf %33 : vector<8x32xf32> to vector<8x32xbf16>
    %c0_14 = arith.constant 0 : index
    %c0_15 = arith.constant 0 : index
    %c0_16 = arith.constant 0 : index
    %35 = vector.load %arg6[%c0_14, %c0_15, %c0_16] : memref<1x8x32xbf16, #tpu.memory_space<vmem>>, vector<1x8x32xbf16>
    %36 = vector.shape_cast %35 : vector<1x8x32xbf16> to vector<8x32xbf16>
    %37 = vector.shape_cast %34 : vector<8x32xbf16> to vector<1x8x32xbf16>
    tpu.vector_store %arg6[%c0_14, %c0_15, %c0_16], %37 {strides = array<i32>} : memref<1x8x32xbf16, #tpu.memory_space<vmem>>, vector<1x8x32xbf16>,
    return
  }
  func.func @transform_0(%arg0: i32) -> (i32, i32, i32) {
    %c0_i32 = arith.constant 0 : i32
    %c0_i32_0 = arith.constant 0 : i32
    %c0_i32_1 = arith.constant 0 : i32
    return %arg0, %c0_i32, %c0_i32_0 : i32, i32, i32
  }
  func.func @transform_1(%arg0: i32) -> (i32, i32) {
    %c0_i32 = arith.constant 0 : i32
    %c0_i32_0 = arith.constant 0 : i32
    %c0_i32_1 = arith.constant 0 : i32
    return %c0_i32, %c0_i32_0 : i32, i32
  }
  func.func @transform_2(%arg0: i32) -> (i32, i32) {
    %c0_i32 = arith.constant 0 : i32
    %c0_i32_0 = arith.constant 0 : i32
    %c0_i32_1 = arith.constant 0 : i32
    return %c0_i32, %c0_i32_0 : i32, i32
  }
  func.func @transform_3(%arg0: i32) -> (i32, i32) {
    %c0_i32 = arith.constant 0 : i32
    %c0_i32_0 = arith.constant 0 : i32
    %c0_i32_1 = arith.constant 0 : i32
    return %c0_i32, %c0_i32_0 : i32, i32
  }
  func.func @transform_4(%arg0: i32) -> (i32, i32) {
    %c0_i32 = arith.constant 0 : i32
    %c0_i32_0 = arith.constant 0 : i32
    %c0_i32_1 = arith.constant 0 : i32
    return %c0_i32, %c0_i32_0 : i32, i32
  }
  func.func @transform_5(%arg0: i32) -> (i32, i32, i32) {
    %c0_i32 = arith.constant 0 : i32
    %c0_i32_0 = arith.constant 0 : i32
    %c0_i32_1 = arith.constant 0 : i32
    return %arg0, %c0_i32, %c0_i32_0 : i32, i32, i32
  }
}

</mosaic_0001>

<bundles_post_ra>
// kernel: tpu_custom_call.1
= control target key start
LH: loop header
LB: loop body
LE: loop exit
PB: predicated region body
PF: predicated region fallthrough
CT: control target
= control target key end

     0   :  { %10 = vsyncpa [#allocation3], 0  ;;  %s845_s0 = inlined_call_operand.hbm [shape: bf16[2,8,32], index: 0, kind: input, shape index: {}]   ;;  %s846_s1 = inlined_call_operand.hbm [shape: bf16[8,32], index: 1, kind: input, shape index: {}]   ;;  %s847_s2 = inlined_call_operand.vmem [shape: bf16[1,32], index: 2, kind: input, shape index: {}]   ;;  %s848_s3 = inlined_call_operand.vmem [shape: f32[1,32], index: 3, kind: input, shape index: {}]   ;;  %s849_s4 = inlined_call_operand.vmem [shape: f32[1,32], index: 4, kind: input, shape index: {}]   ;;  %s850_s5 = inlined_call_operand.hbm [shape: bf16[2,8,32], index: 5, kind: output, shape index: {}]  }
   0x1   :  { %12 = vsyncpa [#allocation3 + $0x1], 0 }
   0x2   :  { %13 = vsyncpa [#allocation6], 0 }
   0x3   :  { %14 = vsyncpa [#allocation4], 0 }
   0x4   :  { %16 = vsyncpa [#allocation4 + $0x1], 0  ;;  %s631_s18 = smov 0   ;;  %s633_s19 = smov 0  }
   0x5   :  { %s635_s20 = smov 0   ;;  %s637_s21 = smov 0  }
   0x6 LB: > { %s652_s22 = sadd.s32 4294967295, %s596_s21   ;;  %s393_s23 = sadd.s32 4294967294, %s596_s21   ;;  %s596_s21 = sphi %s637_s21, %s874_s21   ;;  %s592_s20 = sphi %s635_s20, %s873_s20   ;;  %s588_s19 = sphi %s633_s19, %s872_s19   ;;  %s584_s18 = sphi %s631_s18, %s871_s18  }
   0x7   : > { %p42_p0 = scmp.ne.s32.totalorder %s588_s19, %s584_s18  ;;  %p851_p1 = scmp.eq.s32.totalorder %s652_s22, 0 }
   0x8   : > { %p156_p3 = scmp.eq.s32.totalorder %s393_s23, 1  ;;  %p394_p5 = scmp.ge.s32.totalorder %s596_s21, 1 }
   0x9   : > { %p661_p4 = por %p851_p1, %p42_p0  ;;  %p163_p7 = scmp.lt.s32.totalorder %s596_s21, 3 }
   0xa   : > { %p666_p6 = por %p156_p3, %p42_p0  ;;  %s598_s27 = smov [#allocation5]  }
   0xb   : > { %s854_s24 = scalar_select %p661_p4, 1, 0 }
   0xc   : > { %s855_s25 = scalar_select %p666_p6, 1, 0 }
   0xd   : > { %p671_p8 = pnand %p394_p5, %p163_p7  ;;  %s176_s28 = sshll.u32 %s598_s27, 4  ;;  %s177_s28 = int_to_ptr.vmem [resolvable:$true] %s176_s28 }
   0xe   : > { %s679_s29 = sadd.s32 1, %s596_s21   ;;  %s29_s8 = sadd.s32 1, %s592_s20 }
   0xf   : > { %s856_s26 = scalar_select %p671_p8, 1, 0 }
  0x10   : > { %p417_p10 = pneg %p671_p8  ;;  %s26_s6 = ssub.s32 %s596_s21, %s679_s29 }
  0x11   : > { %p689_p12 = scmp.eq.s32.totalorder %s26_s6, 0  ;;  %s468_s11 = scalar_lea.hbm %s846_s1, 64 }
  0x12   : > { %p683_p11 = pnand %p417_p10, %p851_p1  ;;  %p469_p0 = scmp.ne.s32.totalorder %s846_s1, %s468_s11 }
  0x13   : > { %s858_s7 = scalar_select %p689_p12, 1, 0 }
  0x14   : > { %p470_p3 = pneg %p683_p11  ;;  %p475_p10 = scmp.lt.u32.totalorder %s468_s11, %s846_s1 }
  0x16   : > { %p471_p5 = pnand %p470_p3, %p469_p0 }
  0x18   : > { %p472_p7 = pneg %p471_p5 }
  0x1a   : > { %p477_p9 = pnand %p475_p10, %p472_p7 }
  0x1c   : > { %480 = shalt.err (!%p477_p9)
}
  0x1d   : > { %s481_s16 = scalar_lea.vmem %s177_s28, 64  ;;  %p489_p6 = scmp.lt.s32.totalorder %s177_s28, %s177_s28 }
  0x1e   : > { %p482_p1 = scmp.ne.s32.totalorder %s177_s28, %s481_s16  ;;  %p490_p4 = scmp.lt.s32.totalorder %s481_s16, %s481_s16 }
  0x20   : > { %p484_p2 = pnand %p482_p1, %p470_p3  ;;  %p491_p8 = por %p490_p4, %p489_p6 }
  0x22   : > { %p485_p13 = pneg %p484_p2 }
  0x24   : > { %p492_p12 = pnand %p491_p8, %p485_p13 }
  0x26   : > { %495 = shalt.err (!%p492_p12)
}
  0x27   : > { %420 = dma.hbm_to_vmem [thread:$0]  (!%p683_p11), %s846_s1, 64, %s177_s28, [#allocation6]  }
  0x28   : > { %p859_p1 = scmp.ne.s32.totalorder %s858_s7, 0  ;;  %p37_p2 = scmp.eq.s32.totalorder %s596_s21, 0 }
  0x29   : > { %p860_p4 = scmp.ne.s32.totalorder %s592_s20, %s588_s19  ;;  %p861_p6 = scmp.eq.s32.totalorder %s652_s22, 1 }
  0x2a   : > { %s715_s27 = scalar_select %p859_p1, %s592_s20, %s29_s8  }
  0x2b   : > { %p723_p8 = por %p861_p6, %p860_p4  ;;  %p430_p9 = scmp.lt.s32.totalorder %s596_s21, 2 }
  0x2c   : > { %s196_s6 = sand.u32 1, %s592_s20   ;;  %p863_p12 = pmov %p860_p4 }
  0x2d   : > { %s397_s9 = sshll.u32 %s196_s6, 2  ;;  %s398_s10 = sshll.u32 %s596_s21, 6 }
  0x2e   : > { %p38_p13 = por %p37_p2, %p863_p12  ;;  %s736_s28 = scalar_lea.hbm %s845_s0, %s398_s10 }
  0x2f   : > { %s200_s7 = scalar_lea.vmem [#allocation2], %s397_s9  ;;  %s197_s14 = scalar_lea.sflag [#allocation3], %s196_s6 }
  0x30   : > { %s207_s8 = sshll.u32 %s200_s7, 4  ;;  %p738_p11 = pnand %p430_p9, %p38_p13  ;;  %s742_s8 = int_to_ptr.vmem [resolvable:$true] %s207_s8 }
  0x31   : > { %s496_s15 = scalar_lea.hbm %s736_s28, 64  ;;  %s501_s23 = scalar_lea.hbm %s845_s0, 128 }
  0x32   : > { %p497_p0 = scmp.ne.s32.totalorder %s736_s28, %s496_s15  ;;  %p498_p3 = pneg %p738_p11 }
  0x33   : > { %p502_p10 = scmp.lt.u32.totalorder %s736_s28, %s845_s0  ;;  %p503_p1 = scmp.lt.u32.totalorder %s501_s23, %s496_s15 }
  0x34   : > { %p499_p5 = pnand %p498_p3, %p497_p0  ;;  %p505_p4 = scmp.lt.u32.totalorder %s496_s15, %s736_s28 }
  0x35   : > { %p504_p2 = por %p503_p1, %p502_p10 }
  0x36   : > { %p500_p7 = pneg %p499_p5 }
  0x37   : > { %p506_p6 = por %p505_p4, %p504_p2 }
  0x39   : > { %p507_p9 = pnand %p506_p6, %p500_p7 }
  0x3b   : > { %510 = shalt.err (!%p507_p9)
}
  0x3c   : > { %s511_s6 = scalar_lea.vmem %s742_s8, 64  ;;  %s599_s11 = smov [#allocation2]  }
  0x3d   : > { %p512_p12 = scmp.ne.s32.totalorder %s742_s8, %s511_s6  ;;  %s516_s12 = sshll.u32 %s599_s11, 4  ;;  %s517_s12 = int_to_ptr.vmem [resolvable:$false] %s516_s12 }
  0x3e   : > { %s518_s7 = scalar_lea.vmem %s517_s12, 128  ;;  %p519_p5 = scmp.lt.s32.totalorder %s742_s8, %s517_s12 }
  0x3f   : > { %p514_p13 = pnand %p512_p12, %p498_p3  ;;  %p520_p10 = scmp.lt.s32.totalorder %s518_s7, %s511_s6 }
  0x41   : > { %p515_p0 = pneg %p514_p13  ;;  %p521_p1 = por %p520_p10, %p519_p5 }
  0x43   : > { %p522_p2 = pnand %p521_p1, %p515_p0 }
  0x45   : > { %525 = shalt.err (!%p522_p2)
}
  0x46   : > { %424 = dma.hbm_to_vmem [thread:$0]  (!%p738_p11), %s736_s28, 64, %s742_s8, %s197_s14  }
  0x47   : > { %p865_p7 = scmp.ne.s32.totalorder %s856_s26, 0 }
  0x48   : > { %s772_s15 = sand.u32 (!%p865_p7), 1, %s588_s19   ;;  %p866_p3 = scmp.ne.s32.totalorder (!%p865_p7), %s854_s24, 0 }
  0x49   : > { %216 = sbr.rel (%p865_p7) target bundleno = 423 (0x1a7), region = 40  ;;  %s400_s16 = sshll.u32 (!%p865_p7), %s772_s15, 2 }
  0x4a   : > { %s219_s17 = scalar_lea.sflag (!%p865_p7), [#allocation3], %s772_s15  ;;  %s222_s23 = scalar_lea.vmem (!%p865_p7), [#allocation2], %s400_s16 }
  0x50   : > { %571 = dma.done.wait (%p866_p3), %s219_s17, 64  }
  0x51   : > { %573 = vsyncadd (%p866_p3), %s219_s17, 4294967232  ;;  %p867_p11 = scmp.eq.s32.totalorder %s652_s22, 0 }
  0x53   : > { %575 = dma.done.wait (%p867_p11), [#allocation6], 64   ;;  %p868_p4 = pmov %p867_p11 }
  0x54   : > { %v260_v0 = vlaneseq  ;;  %v253_v3 = vld [vmem:[%s222_s23] sm:$0xf]  ;;  %v255_v4 = vld [vmem:[#allocation5] sm:$0xf]  ;;  %vm265_vm0 = vcmask 261120   ;;  %s406_s9 = sshll.u32 %s652_s22, 6 }
  0x55   : > { %577 = vsyncadd (%p868_p4), [#allocation6], 4294967232  ;;  %v258_v5 = vld [vmem:[%s847_s2] sm:$0x1]  ;;  %v254_v6 = vunpack.c.l.bf16 %v253_v3  ;;  %v256_v7 = vunpack.c.l.bf16 %v255_v4  ;;  %s252_s10 = scalar_lea.vmem [#allocation7], %s400_s16  ;;  %vm297_vm1 = vcmask 257024   ;;  %s801_s7 = scalar_lea.hbm %s850_s5, %s406_s9 }
  0x56   : > { %v261_v1 = vshrl.u32 %v260_v0, 7  ;;  %v259_v8 = vunpack.c.l.bf16 %v258_v5  ;;  %v403_v22 = vld [vmem:[%s848_s3] ss:$0 sm:$0xff]  ;;  %s313_s6 = sshll.u32 %s252_s10, 4  ;;  %s300_s17 = scalar_lea.sflag [#allocation4], %s772_s15  ;;  %s803_s6 = int_to_ptr.vmem [resolvable:$true] %s313_s6 }
  0x57   : > { %v257_v9 = vadd.f32 %v256_v7, %v254_v6  ;;  %v404_v24 = vld [vmem:[%s849_s4] ss:$0 sm:$0xff]  ;;  %s526_s23 = scalar_lea.vmem %s803_s6, 64  ;;  %s600_s22 = smov [#allocation7]  }
  0x58   : > { %v262_v2 = vsub.s32 0, %v261_v1  ;;  %p527_p6 = scmp.ne.s32.totalorder %s803_s6, %s526_s23  ;;  %s530_s16 = sshll.u32 %s600_s22, 4  ;;  %s531_s16 = int_to_ptr.vmem [resolvable:$false] %s530_s16 }
  0x59   : > { %s532_s26 = scalar_lea.vmem %s531_s16, 128  ;;  %p533_p13 = scmp.lt.s32.totalorder %s803_s6, %s531_s16 }
  0x5a   : > { %v263_v10 = vrot.slane %v259_v8, %v262_v2  ;;  %p528_p9 = pnand %p527_p6, %p723_p8  ;;  %p534_p0 = scmp.lt.s32.totalorder %s532_s26, %s526_s23 }
  0x5c   : > { %v264_v11 = vadd.f32 %v263_v10, %v257_v9  ;;  %p529_p12 = pneg %p528_p9  ;;  %p535_p5 = por %p534_p0, %p533_p13 }
  0x5e   : > { %v266_v12 = vsel %vm265_vm0, %v264_v11, 0.0  ;;  %p536_p10 = pnand %p535_p5, %p529_p12 }
  0x5f   : > { %267 = vadd.xlane.f32.xlu0 %v266_v12 }
  0xec   : > { %v268_v13 = vpop.xlane.xlu0 %267 }
  0xed   : > { %v270_v14 = vmul.f32 0.03125, %v268_v13 }
  0xef   : > { %v271_v15 = vsub.f32 %v264_v11, %v270_v14 }
  0xf1   : > { %v272_v16 = vmul.f32 %v271_v15, %v271_v15 }
  0xf3   : > { %v273_v17 = vsel %vm265_vm0, %v272_v16, 0.0 }
  0xf4   : > { %274 = vadd.xlane.f32.xlu0 %v273_v17 }
 0x181   : > { %v275_v18 = vpop.xlane.xlu0 %274 }
 0x182   : > { %v276_v19 = vmul.f32 0.03125, %v275_v18 }
 0x184   : > { %v277_v20 = vadd.f32 1e-12, %v276_v19 }
 0x186   : > { %466 = vrsqrt.f32 %v277_v20 }
 0x190   : > { %v467_v21 = vpop.eup %466 }
 0x191   : > { %v279_v23 = vmul.f32 %v467_v21, %v271_v15 }
 0x193   : > { %v287_v25 = vmul.f32 %v403_v22, %v279_v23 }
 0x195   : > { %v295_v26 = vadd.f32 %v404_v24, %v287_v25 }
 0x197   : > { %v296_v27 = vpack.c.bf16 %v295_v26, %v295_v26 }
 0x199   : > { %298 = vst.msk [vmem:[%s252_s10] sm:$0xf] %vm297_vm1, %v296_v27 }
 0x19a   : > { %539 = shalt.err (!%p536_p10)
}
 0x19b   : > { %s540_s15 = scalar_lea.hbm %s801_s7, 64  ;;  %s544_s8 = scalar_lea.hbm %s850_s5, 128 }
 0x19c   : > { %p541_p1 = scmp.ne.s32.totalorder %s801_s7, %s540_s15  ;;  %p545_p3 = scmp.lt.u32.totalorder %s801_s7, %s850_s5 }
 0x19d   : > { %p546_p11 = scmp.lt.u32.totalorder %s544_s8, %s540_s15  ;;  %p548_p6 = scmp.lt.u32.totalorder %s540_s15, %s801_s7 }
 0x19e   : > { %p542_p2 = pnand %p541_p1, %p723_p8 }
 0x19f   : > { %p547_p4 = por %p546_p11, %p545_p3 }
 0x1a0   : > { %p543_p7 = pneg %p542_p2 }
 0x1a1   : > { %p549_p9 = por %p548_p6, %p547_p4 }
 0x1a3   : > { %p550_p12 = pnand %p549_p9, %p543_p7 }
 0x1a5   : > { %553 = shalt.err (!%p550_p12)
}
 0x1a6   : > { %415 = dma.vmem_to_hbm [thread:$0]  (%p723_p8), %s803_s6, 64, %s801_s7, %s300_s17  }
 0x1a7 PF: > { %s325_s9 = sand.u32 1, %s584_s18   ;;  %p869_p13 = scmp.ne.s32.totalorder %s855_s25, 0 }
 0x1a8   : > { %p870_p0 = scmp.ge.s32.totalorder %s596_s21, 2  ;;  %s326_s10 = scalar_lea.sflag [#allocation4], %s325_s9 }
 0x1aa   : > { %p426_p5 = pnand %p870_p0, %p869_p13 }
 0x1ac   : > { %579 = dma.done.wait (!%p426_p5), %s326_s10, 64  }
 0x1ad   : > { %581 = vsyncadd (!%p426_p5), %s326_s10, 4294967232  ;;  %p19_p10 = scmp.ge.s32.totalorder %s679_s29, 4   ;;  %s871_s18 = smov %s588_s19 }
 0x1ae   : > { %s872_s19 = smov %s592_s20  ;;  %s873_s20 = smov %s715_s27 }
 0x1af   : > { %s874_s21 = smov %s679_s29  ;;  %21 = sbr.rel (!%p19_p10) target bundleno = 6 (0x6), region = 89 }
 0x1b6   :  { %331 = vsyncpa [#allocation3], 1 }
 0x1b7   :  { %333 = vsyncpa [#allocation3 + $0x1], 1 }
 0x1b8   :  { %334 = vsyncpa [#allocation6], 1 }
 0x1b9   :  { %335 = vsyncpa [#allocation4], 1 }
 0x1ba   :  { %337 = vsyncpa [#allocation4 + $0x1], 1 }

</bundles_post_ra>
